<compile_context>
chip_gen: v7x
topology: tpu7x:2x2x1
jax: 0.10.0
libtpu: 0.0.40
codegen_flags: <defaults>
</compile_context>

<pallas_src>
import functools

import jax
import jax.numpy as jnp
from jax.experimental import pallas as pl
from jax.experimental.pallas import tpu as pltpu


def _round_up(n, m):
    return (n + m - 1) // m * m


def _cdiv(a, b):
    return -(-a // b)


# -----------------------------------------------------------------------------
# Hardware detection (cached):
#   (per-core VMEM bytes, # TensorCores sharing the "parallel" axis, lane/MXU
#    alignment used to pad d_model).
# -----------------------------------------------------------------------------
@functools.lru_cache(maxsize=None)
def _tpu_config():
    kind = ""
    try:
        kind = jax.devices()[0].device_kind.lower()
    except Exception:
        pass
    if "v6" in kind:                                        # v6e: 128 MiB, 1 TC, 256x256 MXU
        return (128 << 20, 1, 256)
    if "v5e" in kind or "v5 lite" in kind or "v5lite" in kind:
        return (128 << 20, 1, 128)                          # v5e: 128 MiB, 1 TC, 128x128 MXU
    if "v5" in kind or "v4" in kind:                        # v5p / v4: megacore (2 TCs)
        return (128 << 20, 2, 128)
    if "v3" in kind or "v2" in kind:                        # small-VMEM older chips
        return (16 << 20, 1, 128)
    return (64 << 20, 2, 256)                               # v7x / unknown: 64 MiB/TC, 2 TCs


# -----------------------------------------------------------------------------
# Kernel
# -----------------------------------------------------------------------------
def res_linear_kernel(x_ref, w0_ref, b0_ref, w1_ref, b1_ref, o_ref):
    """One (tm, Dp) row tile of  out = x + relu(x @ W0 + b0) @ W1 + b1.

    Weights arrive pre-transposed to (in, out) layout, so both contractions are
    native MXU matmuls (no per-tile RHS transpose on the XLU)."""
    x = x_ref[...]                                   # (tm, Dp), caller dtype
    cd = w0_ref.dtype                                # MXU compute dtype (bf16 / f32)
    h = jnp.dot(x.astype(cd), w0_ref[...], preferred_element_type=jnp.float32)
    h = jnp.maximum(h + b0_ref[...], 0.0)            # bias + ReLU in f32
    y = jnp.dot(h.astype(cd), w1_ref[...], preferred_element_type=jnp.float32)
    out = x.astype(jnp.float32) + y + b1_ref[...]    # residual in f32
    o_ref[...] = out.astype(o_ref.dtype)


# -----------------------------------------------------------------------------
# One-time parameter preparation (hoisted out of the forward path)
# -----------------------------------------------------------------------------
def prepare_res_linear_params(w0, b0, w1, b1, *, compute_dtype=jnp.bfloat16,
                              lane_align=None):
    """Transpose PyTorch (out, in) weights to (in, out), pad d_model to the
    MXU/lane alignment, and cast to the matmul compute dtype.  Call once at
    init and reuse across forward calls."""
    if lane_align is None:
        lane_align = _tpu_config()[2]
    D = w0.shape[0]
    Dp = _round_up(D, lane_align)

    def prep_w(w):
        wt = jnp.asarray(w).T                         # (in, out): native MXU layout
        if Dp != D:
            wt = jnp.pad(wt, ((0, Dp - D), (0, Dp - D)))
        return wt.astype(compute_dtype)

    def prep_b(b):
        bp = jnp.asarray(b, jnp.float32)
        if Dp != D:
            bp = jnp.pad(bp, (0, Dp - D))
        return bp.reshape(1, Dp)

    return {"D": D, "Dp": Dp, "compute_dtype": jnp.dtype(compute_dtype),
            "w0": prep_w(w0), "b0": prep_b(b0),
            "w1": prep_w(w1), "b1": prep_b(b1)}


# -----------------------------------------------------------------------------
# Tiling / VMEM policy
# -----------------------------------------------------------------------------
def _vmem_footprint(Dp, tm, x_bytes, out_bytes, w_bytes):
    weights = 2 * Dp * Dp * w_bytes        # two resident, single-buffered weights
    biases = 2 * 2 * Dp * 4                # two biases (double-counted as slack)
    x_io = 2 * tm * Dp * x_bytes           # double-buffered input tile
    o_io = 2 * tm * Dp * out_bytes         # double-buffered output tile
    scratch = 3 * tm * Dp * 4              # f32 intermediates (h / acc / residual)
    return weights + biases + x_io + o_io + scratch


def _choose_tm(M, Dp, tm_hint, num_cores, vmem_cap, x_bytes, out_bytes, w_bytes):
    budget = int(vmem_cap * 0.85)
    tm = max(8, _round_up(min(tm_hint, _round_up(M, 8)), 8))
    # Keep the "parallel" M grid >= 2 * num_cores steps (when M allows) so all
    # TensorCores get work (v7x has 2 per chip) and the x/out DMAs have enough
    # steps to pipeline against.
    if num_cores > 1:
        target_steps = 2 * num_cores
        if M >= 8 * target_steps:
            tm = min(tm, max(8, _round_up(_cdiv(M, target_steps), 8)))
    # Shrink until the estimated VMEM footprint fits the budget.
    while tm > 8 and _vmem_footprint(Dp, tm, x_bytes, out_bytes, w_bytes) > budget:
        tm = max(8, _round_up(tm // 2, 8))
    return tm


# -----------------------------------------------------------------------------
# Forward
# -----------------------------------------------------------------------------
_WEIGHT_SINGLE_BUFFER_OK = None   # resolved on first call (pipeline_mode support)


def res_linear_fwd(x, params, *, tm=None):
    """Apply ResLinear to x of shape (..., d_model) using prepared params."""
    global _WEIGHT_SINGLE_BUFFER_OK
    D, Dp = params["D"], params["Dp"]
    assert x.shape[-1] == D, f"expected last dim {D}, got {x.shape[-1]}"
    orig_shape = x.shape
    x2d = x.reshape(-1, D)
    M = x2d.shape[0]

    vmem_cap, num_cores, _ = _tpu_config()
    x_bytes = jnp.dtype(x.dtype).itemsize
    out_bytes = x_bytes                      # output keeps the caller dtype
    w_bytes = params["compute_dtype"].itemsize
    if tm is None:
        # Generation-aware default: big tiles on the 128 MiB chips (v5e/v6e),
        # smaller on v7x (64 MiB/TC and 2 TCs that must both get grid steps).
        tm = 256 if num_cores > 1 else (1024 if Dp <= 2048 else 512)
    tm_eff = _choose_tm(M, Dp, tm, num_cores, vmem_cap, x_bytes, out_bytes, w_bytes)
    Mp = _round_up(M, tm_eff)

    xp = x2d if (Mp == M and Dp == D) else jnp.pad(x2d, ((0, Mp - M), (0, Dp - D)))

    footprint = _vmem_footprint(Dp, tm_eff, x_bytes, out_bytes, w_bytes)
    # Budgeted limit: footprint + margin, capped below physical VMEM (leaves
    # headroom for Mosaic internal scratch; never the full 64 MiB on v7x).
    vmem_limit = min(int(vmem_cap * 0.85), max(footprint + (16 << 20), 32 << 20))
    # TODO(synk): if `footprint` (dominated by the 2*Dp^2 resident weights)
    # exceeds the budget, switch to a weight-panel-streaming variant (extra
    # N/K grid axis, pl.Buffered(2-3) weight specs) instead of this scheme.

    cost = pl.CostEstimate(
        flops=int(4 * Mp * Dp * Dp),                     # two Dp x Dp matmuls
        transcendentals=0,
        bytes_accessed=int(Mp * Dp * (x_bytes + out_bytes)
                           + 2 * Dp * Dp * w_bytes + 2 * Dp * 4),
    )

    x_spec = pl.BlockSpec((tm_eff, Dp), lambda i: (i, 0))
    o_spec = pl.BlockSpec((tm_eff, Dp), lambda i: (i, 0))

    def const_spec(shape, single_buffer):
        idx_map = lambda i: (0,) * len(shape)
        if single_buffer:
            # Constant index_map -> no pipelining needed; single-buffer to halve
            # the resident VMEM for weights and biases.
            return pl.BlockSpec(shape, idx_map, pipeline_mode=pl.Buffered(1))
        return pl.BlockSpec(shape, idx_map)

    prefer = True if _WEIGHT_SINGLE_BUFFER_OK is None else _WEIGHT_SINGLE_BUFFER_OK
    last_err = None
    for single_buffer in (prefer, not prefer):
        try:
            out_p = pl.pallas_call(
                res_linear_kernel,
                out_shape=jax.ShapeDtypeStruct((Mp, Dp), x.dtype),
                grid_spec=pltpu.PrefetchScalarGridSpec(
                    num_scalar_prefetch=0,
                    grid=(Mp // tm_eff,),
                    in_specs=[
                        x_spec,                                  # x row tile (pipelined)
                        const_spec((Dp, Dp), single_buffer),     # W0 (resident)
                        const_spec((1, Dp), single_buffer),      # b0
                        const_spec((Dp, Dp), single_buffer),     # W1 (resident)
                        const_spec((1, Dp), single_buffer),      # b1
                    ],
                    out_specs=o_spec,
                ),
                compiler_params=pltpu.CompilerParams(
                    dimension_semantics=("parallel",),
                    vmem_limit_bytes=int(vmem_limit),
                ),
                cost_estimate=cost,
            )(xp, params["w0"], params["b0"], params["w1"], params["b1"])
            if _WEIGHT_SINGLE_BUFFER_OK != single_buffer:
                # Probing this configuration for the first time: surface any
                # lowering / compile error here so the fallback can kick in.
                out_p = jax.block_until_ready(out_p)
            _WEIGHT_SINGLE_BUFFER_OK = single_buffer
            return out_p[:M, :D].reshape(orig_shape)
        except Exception as e:   # pipeline_mode / Buffered(1) unsupported, etc.
            last_err = e
    raise last_err


def res_linear(x, w0, b0, w1, b1, *, compute_dtype=jnp.bfloat16, tm=None):
    """Convenience wrapper: prepare params + forward.  For repeated forwards,
    call prepare_res_linear_params once and reuse it with res_linear_fwd."""
    params = prepare_res_linear_params(w0, b0, w1, b1, compute_dtype=compute_dtype)
    return res_linear_fwd(x, params, tm=tm)


def res_linear_ref(x, w0, b0, w1, b1):
    h = jnp.maximum(x @ w0.T + b0, 0.0)
    return x + (h @ w1.T + b1)


if __name__ == "__main__":
    batch, seq, d_model = 2, 8, 32
    key = jax.random.PRNGKey(0)
    kx, k0w, k0b, k1w, k1b = jax.random.split(key, 5)

    x = jax.random.normal(kx, (batch, seq, d_model), dtype=jnp.float32)
    # PyTorch-style init: uniform(-1/sqrt(fan_in), 1/sqrt(fan_in))
    bound = 1.0 / (d_model ** 0.5)
    w0 = jax.random.uniform(k0w, (d_model, d_model), jnp.float32, -bound, bound)
    b0 = jax.random.uniform(k0b, (d_model,), jnp.float32, -bound, bound)
    w1 = jax.random.uniform(k1w, (d_model, d_model), jnp.float32, -bound, bound)
    b1 = jax.random.uniform(k1b, (d_model,), jnp.float32, -bound, bound)

    ref = res_linear_ref(x, w0, b0, w1, b1)

    # Preferred config: bf16 MXU operands, one-time weight prep reused here.
    params_bf16 = prepare_res_linear_params(w0, b0, w1, b1,
                                            compute_dtype=jnp.bfloat16)
    out_bf16 = jax.block_until_ready(res_linear_fwd(x, params_bf16))
    assert out_bf16.shape == x.shape and out_bf16.dtype == x.dtype
    assert jnp.allclose(out_bf16, ref, atol=3e-2, rtol=3e-2), \
        "bf16-compute path mismatch vs reference"

    # Exact-semantics check: f32 compute path, tight tolerance.
    params_f32 = prepare_res_linear_params(w0, w0 * 0 + b0[None, :d_model][0] if False else b0,
                                           w1, b1, compute_dtype=jnp.float32) \
        if False else prepare_res_linear_params(w0, b0, w1, b1,
                                                compute_dtype=jnp.float32)
    out_f32 = jax.block_until_ready(res_linear_fwd(x, params_f32))
    assert jnp.allclose(out_f32, ref, atol=1e-4, rtol=1e-4), \
        "f32-compute path mismatch vs reference"

    print("KERNEL_OK")
</pallas_src>

<mosaic_0001>
module attributes {stable_mosaic.version = 11 : i64} {
  func.func @res_linear_kernel(%arg0: i32, %arg1: memref<16x256xf32, #tpu.memory_space<vmem>>, %arg2: memref<256x256xbf16, #tpu.memory_space<vmem>>, %arg3: memref<1x256xf32, #tpu.memory_space<vmem>>, %arg4: memref<256x256xbf16, #tpu.memory_space<vmem>>, %arg5: memref<1x256xf32, #tpu.memory_space<vmem>>, %arg6: memref<16x256xf32, #tpu.memory_space<vmem>>) attributes {dimension_semantics = [#tpu.dimension_semantics<parallel>], iteration_bounds = array<i64: 1>, scalar_prefetch = 0 : i64, scratch_operands = 0 : i64, tpu.core_type = #tpu.core_type<tc>, window_params = [{transform_indices = @transform_0, window_bounds = array<i64: 16, 256>}, {pipeline_mode = #tpu.pipeline_mode<synchronous>, transform_indices = @transform_1, window_bounds = array<i64: 256, 256>}, {pipeline_mode = #tpu.pipeline_mode<synchronous>, transform_indices = @transform_2, window_bounds = array<i64: 1, 256>}, {pipeline_mode = #tpu.pipeline_mode<synchronous>, transform_indices = @transform_3, window_bounds = array<i64: 256, 256>}, {pipeline_mode = #tpu.pipeline_mode<synchronous>, transform_indices = @transform_4, window_bounds = array<i64: 1, 256>}, {transform_indices = @transform_5, window_bounds = array<i64: 16, 256>}]} {
    %c0 = arith.constant 0 : index
    %c0_0 = arith.constant 0 : index
    %0 = vector.load %arg1[%c0, %c0_0] : memref<16x256xf32, #tpu.memory_space<vmem>>, vector<16x256xf32>
    %1 = arith.truncf %0 : vector<16x256xf32> to vector<16x256xbf16>
    %c0_1 = arith.constant 0 : index
    %c0_2 = arith.constant 0 : index
    %2 = vector.load %arg2[%c0_1, %c0_2] : memref<256x256xbf16, #tpu.memory_space<vmem>>, vector<256x256xbf16>
    %cst = arith.constant dense<0.000000e+00> : vector<16x256xf32>
    %3 = tpu.matmul %1, %2, %cst {dimension_numbers = #tpu.dot_dimension_numbers<[1], [0], [0], [1], [0, 0, 1, 1], [], []>} : vector<16x256xbf16>, vector<256x256xbf16>, vector<16x256xf32> -> vector<16x256xf32>
    %c0_3 = arith.constant 0 : index
    %c0_4 = arith.constant 0 : index
    %4 = vector.load %arg3[%c0_3, %c0_4] : memref<1x256xf32, #tpu.memory_space<vmem>>, vector<1x256xf32>
    %5 = vector.broadcast %4 : vector<1x256xf32> to vector<16x256xf32>
    %6 = arith.addf %3, %5 : vector<16x256xf32>
    %cst_5 = arith.constant 0.000000e+00 : f32
    %7 = vector.broadcast %cst_5 : f32 to vector<16x256xf32>
    %8 = arith.maximumf %6, %7 : vector<16x256xf32>
    %9 = arith.truncf %8 : vector<16x256xf32> to vector<16x256xbf16>
    %c0_6 = arith.constant 0 : index
    %c0_7 = arith.constant 0 : index
    %10 = vector.load %arg4[%c0_6, %c0_7] : memref<256x256xbf16, #tpu.memory_space<vmem>>, vector<256x256xbf16>
    %cst_8 = arith.constant dense<0.000000e+00> : vector<16x256xf32>
    %11 = tpu.matmul %9, %10, %cst_8 {dimension_numbers = #tpu.dot_dimension_numbers<[1], [0], [0], [1], [0, 0, 1, 1], [], []>} : vector<16x256xbf16>, vector<256x256xbf16>, vector<16x256xf32> -> vector<16x256xf32>
    %12 = arith.addf %0, %11 : vector<16x256xf32>
    %c0_9 = arith.constant 0 : index
    %c0_10 = arith.constant 0 : index
    %13 = vector.load %arg5[%c0_9, %c0_10] : memref<1x256xf32, #tpu.memory_space<vmem>>, vector<1x256xf32>
    %14 = vector.broadcast %13 : vector<1x256xf32> to vector<16x256xf32>
    %15 = arith.addf %12, %14 : vector<16x256xf32>
    %c0_11 = arith.constant 0 : index
    %c0_12 = arith.constant 0 : index
    %16 = vector.load %arg6[%c0_11, %c0_12] : memref<16x256xf32, #tpu.memory_space<vmem>>, vector<16x256xf32>
    tpu.vector_store %arg6[%c0_11, %c0_12], %15 {strides = array<i32>} : memref<16x256xf32, #tpu.memory_space<vmem>>, vector<16x256xf32>,
    return
  }
  func.func @transform_0(%arg0: i32) -> (i32, i32) {
    %c0_i32 = arith.constant 0 : i32
    %c0_i32_0 = arith.constant 0 : i32
    return %arg0, %c0_i32 : i32, i32
  }
  func.func @transform_1(%arg0: i32) -> (i32, i32) {
    %c0_i32 = arith.constant 0 : i32
    %c0_i32_0 = arith.constant 0 : i32
    %c0_i32_1 = arith.constant 0 : i32
    return %c0_i32, %c0_i32_0 : i32, i32
  }
  func.func @transform_2(%arg0: i32) -> (i32, i32) {
    %c0_i32 = arith.constant 0 : i32
    %c0_i32_0 = arith.constant 0 : i32
    %c0_i32_1 = arith.constant 0 : i32
    return %c0_i32, %c0_i32_0 : i32, i32
  }
  func.func @transform_3(%arg0: i32) -> (i32, i32) {
    %c0_i32 = arith.constant 0 : i32
    %c0_i32_0 = arith.constant 0 : i32
    %c0_i32_1 = arith.constant 0 : i32
    return %c0_i32, %c0_i32_0 : i32, i32
  }
  func.func @transform_4(%arg0: i32) -> (i32, i32) {
    %c0_i32 = arith.constant 0 : i32
    %c0_i32_0 = arith.constant 0 : i32
    %c0_i32_1 = arith.constant 0 : i32
    return %c0_i32, %c0_i32_0 : i32, i32
  }
  func.func @transform_5(%arg0: i32) -> (i32, i32) {
    %c0_i32 = arith.constant 0 : i32
    %c0_i32_0 = arith.constant 0 : i32
    return %arg0, %c0_i32 : i32, i32
  }
}

module attributes {stable_mosaic.version = 11 : i64} {
  func.func @res_linear_kernel(%arg0: i32, %arg1: memref<16x256xf32, #tpu.memory_space<vmem>>, %arg2: memref<256x256xbf16, #tpu.memory_space<vmem>>, %arg3: memref<1x256xf32, #tpu.memory_space<vmem>>, %arg4: memref<256x256xbf16, #tpu.memory_space<vmem>>, %arg5: memref<1x256xf32, #tpu.memory_space<vmem>>, %arg6: memref<16x256xf32, #tpu.memory_space<vmem>>) attributes {dimension_semantics = [#tpu.dimension_semantics<parallel>], iteration_bounds = array<i64: 1>, scalar_prefetch = 0 : i64, scratch_operands = 0 : i64, tpu.core_type = #tpu.core_type<tc>, window_params = [{transform_indices = @transform_0, window_bounds = array<i64: 16, 256>}, {pipeline_mode = #tpu.pipeline_mode<synchronous>, transform_indices = @transform_1, window_bounds = array<i64: 256, 256>}, {pipeline_mode = #tpu.pipeline_mode<synchronous>, transform_indices = @transform_2, window_bounds = array<i64: 1, 256>}, {pipeline_mode = #tpu.pipeline_mode<synchronous>, transform_indices = @transform_3, window_bounds = array<i64: 256, 256>}, {pipeline_mode = #tpu.pipeline_mode<synchronous>, transform_indices = @transform_4, window_bounds = array<i64: 1, 256>}, {transform_indices = @transform_5, window_bounds = array<i64: 16, 256>}]} {
    %c0 = arith.constant 0 : index
    %c0_0 = arith.constant 0 : index
    %0 = vector.load %arg1[%c0, %c0_0] : memref<16x256xf32, #tpu.memory_space<vmem>>, vector<16x256xf32>
    %1 = arith.truncf %0 : vector<16x256xf32> to vector<16x256xbf16>
    %c0_1 = arith.constant 0 : index
    %c0_2 = arith.constant 0 : index
    %2 = vector.load %arg2[%c0_1, %c0_2] : memref<256x256xbf16, #tpu.memory_space<vmem>>, vector<256x256xbf16>
    %cst = arith.constant dense<0.000000e+00> : vector<16x256xf32>
    %3 = tpu.matmul %1, %2, %cst {dimension_numbers = #tpu.dot_dimension_numbers<[1], [0], [0], [1], [0, 0, 1, 1], [], []>} : vector<16x256xbf16>, vector<256x256xbf16>, vector<16x256xf32> -> vector<16x256xf32>
    %c0_3 = arith.constant 0 : index
    %c0_4 = arith.constant 0 : index
    %4 = vector.load %arg3[%c0_3, %c0_4] : memref<1x256xf32, #tpu.memory_space<vmem>>, vector<1x256xf32>
    %5 = vector.broadcast %4 : vector<1x256xf32> to vector<16x256xf32>
    %6 = arith.addf %3, %5 : vector<16x256xf32>
    %cst_5 = arith.constant 0.000000e+00 : f32
    %7 = vector.broadcast %cst_5 : f32 to vector<16x256xf32>
    %8 = arith.maximumf %6, %7 : vector<16x256xf32>
    %9 = arith.truncf %8 : vector<16x256xf32> to vector<16x256xbf16>
    %c0_6 = arith.constant 0 : index
    %c0_7 = arith.constant 0 : index
    %10 = vector.load %arg4[%c0_6, %c0_7] : memref<256x256xbf16, #tpu.memory_space<vmem>>, vector<256x256xbf16>
    %cst_8 = arith.constant dense<0.000000e+00> : vector<16x256xf32>
    %11 = tpu.matmul %9, %10, %cst_8 {dimension_numbers = #tpu.dot_dimension_numbers<[1], [0], [0], [1], [0, 0, 1, 1], [], []>} : vector<16x256xbf16>, vector<256x256xbf16>, vector<16x256xf32> -> vector<16x256xf32>
    %12 = arith.addf %0, %11 : vector<16x256xf32>
    %c0_9 = arith.constant 0 : index
    %c0_10 = arith.constant 0 : index
    %13 = vector.load %arg5[%c0_9, %c0_10] : memref<1x256xf32, #tpu.memory_space<vmem>>, vector<1x256xf32>
    %14 = vector.broadcast %13 : vector<1x256xf32> to vector<16x256xf32>
    %15 = arith.addf %12, %14 : vector<16x256xf32>
    %c0_11 = arith.constant 0 : index
    %c0_12 = arith.constant 0 : index
    %16 = vector.load %arg6[%c0_11, %c0_12] : memref<16x256xf32, #tpu.memory_space<vmem>>, vector<16x256xf32>
    tpu.vector_store %arg6[%c0_11, %c0_12], %15 {strides = array<i32>} : memref<16x256xf32, #tpu.memory_space<vmem>>, vector<16x256xf32>,
    return
  }
  func.func @transform_0(%arg0: i32) -> (i32, i32) {
    %c0_i32 = arith.constant 0 : i32
    %c0_i32_0 = arith.constant 0 : i32
    return %arg0, %c0_i32 : i32, i32
  }
  func.func @transform_1(%arg0: i32) -> (i32, i32) {
    %c0_i32 = arith.constant 0 : i32
    %c0_i32_0 = arith.constant 0 : i32
    %c0_i32_1 = arith.constant 0 : i32
    return %c0_i32, %c0_i32_0 : i32, i32
  }
  func.func @transform_2(%arg0: i32) -> (i32, i32) {
    %c0_i32 = arith.constant 0 : i32
    %c0_i32_0 = arith.constant 0 : i32
    %c0_i32_1 = arith.constant 0 : i32
    return %c0_i32, %c0_i32_0 : i32, i32
  }
  func.func @transform_3(%arg0: i32) -> (i32, i32) {
    %c0_i32 = arith.constant 0 : i32
    %c0_i32_0 = arith.constant 0 : i32
    %c0_i32_1 = arith.constant 0 : i32
    return %c0_i32, %c0_i32_0 : i32, i32
  }
  func.func @transform_4(%arg0: i32) -> (i32, i32) {
    %c0_i32 = arith.constant 0 : i32
    %c0_i32_0 = arith.constant 0 : i32
    %c0_i32_1 = arith.constant 0 : i32
    return %c0_i32, %c0_i32_0 : i32, i32
  }
  func.func @transform_5(%arg0: i32) -> (i32, i32) {
    %c0_i32 = arith.constant 0 : i32
    %c0_i32_0 = arith.constant 0 : i32
    return %arg0, %c0_i32 : i32, i32
  }
}

</mosaic_0001>

<bundles_post_ra>
// kernel: tpu_custom_call.1
= control target key start
LH: loop header
LB: loop body
LE: loop exit
PB: predicated region body
PF: predicated region fallthrough
CT: control target
= control target key end

     0   :  { %10 = vsyncpa [#allocation3], 0  ;;  %s976_s0 = inlined_call_operand.hbm [shape: f32[16,256], index: 0, kind: input, shape index: {}]   ;;  %s977_s1 = inlined_call_operand.hbm [shape: bf16[256,256], index: 1, kind: input, shape index: {}]   ;;  %s978_s2 = inlined_call_operand.vmem [shape: f32[1,256], index: 2, kind: input, shape index: {}]   ;;  %s979_s3 = inlined_call_operand.hbm [shape: bf16[256,256], index: 3, kind: input, shape index: {}]   ;;  %s980_s4 = inlined_call_operand.vmem [shape: f32[1,256], index: 4, kind: input, shape index: {}]   ;;  %s981_s5 = inlined_call_operand.hbm [shape: f32[16,256], index: 5, kind: output, shape index: {}]  }
   0x1   :  { %11 = vsyncpa [#allocation6], 0 }
   0x2   :  { %12 = vsyncpa [#allocation4], 0  ;;  %s860_s18 = smov [#allocation5]   ;;  %s766_s22 = scalar_lea.hbm %s977_s1, 4096 }
   0x3   :  { %s30_s19 = sshll.u32 %s860_s18, 4  ;;  %p767_p0 = scmp.ne.s32.totalorder %s977_s1, %s766_s22  ;;  %s31_s19 = int_to_ptr.vmem [resolvable:$true] %s30_s19 }
   0x4   :  { %p770_p1 = scmp.lt.u32.totalorder %s766_s22, %s977_s1 }
   0x6   :  { %p772_p2 = pnand %p770_p1, %p767_p0 }
   0x8   :  { %775 = shalt.err (!%p772_p2)
}
   0x9   :  { %s776_s27 = scalar_lea.vmem %s31_s19, 4096  ;;  %p781_p4 = scmp.lt.s32.totalorder %s31_s19, %s31_s19 }
   0xa   :  { %p777_p3 = scmp.ne.s32.totalorder %s31_s19, %s776_s27  ;;  %p782_p5 = scmp.lt.s32.totalorder %s776_s27, %s776_s27 }
   0xc   :  { %p783_p6 = por %p782_p5, %p781_p4 }
   0xe   :  { %p784_p7 = pnand %p783_p6, %p777_p3 }
  0x10   :  { %787 = shalt.err (!%p784_p7)
}
  0x11   :  { %s861_s28 = smov 128   ;;  %s862_s29 = smov 8  }
  0x12   :  { %36 = dma.hbm_to_vmem [thread:$0]  %s977_s1, 4096, %s31_s19, [#allocation6], %s861_s28, %s861_s28, %s862_s29  }
  0x13   :  { %s863_s7 = smov [#allocation2]   ;;  %s788_s11 = scalar_lea.hbm %s976_s0, 512 }
  0x14   :  { %s18_s8 = sshll.u32 %s863_s7, 4  ;;  %p789_p8 = scmp.ne.s32.totalorder %s976_s0, %s788_s11  ;;  %s19_s8 = int_to_ptr.vmem [resolvable:$true] %s18_s8 }
  0x15   :  { %p792_p9 = scmp.lt.u32.totalorder %s788_s11, %s976_s0 }
  0x17   :  { %p794_p10 = pnand %p792_p9, %p789_p8 }
  0x19   :  { %797 = shalt.err (!%p794_p10)
}
  0x1a   :  { %s798_s16 = scalar_lea.vmem %s19_s8, 512  ;;  %p803_p12 = scmp.lt.s32.totalorder %s19_s8, %s19_s8 }
  0x1b   :  { %p799_p11 = scmp.ne.s32.totalorder %s19_s8, %s798_s16  ;;  %p804_p13 = scmp.lt.s32.totalorder %s798_s16, %s798_s16 }
  0x1d   :  { %p805_p0 = por %p804_p13, %p803_p12 }
  0x1f   :  { %p806_p1 = pnand %p805_p0, %p799_p11 }
  0x21   :  { %809 = shalt.err (!%p806_p1)
}
  0x22   :  { %s864_s1 = smov 256   ;;  %s865_s17 = smov 16  }
  0x23   :  { %24 = dma.hbm_to_vmem [thread:$0]  %s976_s0, 512, %s19_s8, [#allocation3], %s864_s1, %s864_s1, %s865_s17  }
  0x24   :  { %s866_s20 = smov [#allocation7]   ;;  %s810_s24 = scalar_lea.hbm %s979_s3, 4096 }
  0x25   :  { %s44_s21 = sshll.u32 %s866_s20, 4  ;;  %p811_p2 = scmp.ne.s32.totalorder %s979_s3, %s810_s24  ;;  %s45_s21 = int_to_ptr.vmem [resolvable:$true] %s44_s21 }
  0x26   :  { %p814_p3 = scmp.lt.u32.totalorder %s810_s24, %s979_s3 }
  0x28   :  { %p816_p4 = pnand %p814_p3, %p811_p2 }
  0x2a   :  { %819 = shalt.err (!%p816_p4)
}
  0x2b   :  { %s820_s6 = scalar_lea.vmem %s45_s21, 4096  ;;  %p825_p6 = scmp.lt.s32.totalorder %s45_s21, %s45_s21 }
  0x2c   :  { %p821_p5 = scmp.ne.s32.totalorder %s45_s21, %s820_s6  ;;  %p826_p7 = scmp.lt.s32.totalorder %s820_s6, %s820_s6 }
  0x2e   :  { %p827_p8 = por %p826_p7, %p825_p6 }
  0x30   :  { %p828_p9 = pnand %p827_p8, %p821_p5 }
  0x32   :  { %831 = shalt.err (!%p828_p9)
}
  0x33   :  { %50 = dma.hbm_to_vmem [thread:$0]  %s979_s3, 4096, %s45_s21, [#allocation6], %s861_s28, %s861_s28, %s862_s29  }
  0x34   :  { %854 = dma.done.wait [#allocation3], 512  }
  0x35   :  { %855 = vsyncadd [#allocation3], 4294966784 }
  0x36   :  { %856 = dma.done.wait [#allocation6], 8192  }
  0x37   :  { %857 = vsyncadd [#allocation6], 4294959104  ;;  %v670_v0 = vld [vmem:[#allocation5 + $0x4] ss:$8 sps:$4 sm:$0xff]   ;;  %v672_v1 = vld [vmem:[#allocation5] ss:$8 sps:$4 sm:$0xff]  }
  0x38   :  { %272 = vmatprep.subr.bf16.mxu0 %v670_v0  ;;  %v673_v2 = vld [vmem:[#allocation5 + $0x14] ss:$8 sps:$4 sm:$0xff]   ;;  %v675_v3 = vld [vmem:[#allocation5 + $0x10] ss:$8 sps:$4 sm:$0xff]   ;;  %v676_v4 = vld [vmem:[#allocation5 + $0x24] ss:$8 sps:$4 sm:$0xff]  }
  0x39   :  { %273 = vmatpush1.bf16.msra.mxu0 %v672_v1  ;;  %v678_v5 = vld [vmem:[#allocation5 + $0x20] ss:$8 sps:$4 sm:$0xff]   ;;  %v679_v6 = vld [vmem:[#allocation5 + $0x34] ss:$8 sps:$4 sm:$0xff]   ;;  %v681_v7 = vld [vmem:[#allocation5 + $0x30] ss:$8 sps:$4 sm:$0xff]  }
  0x3a   :  { %274 = vmatprep.subr.bf16.mxu0 %v673_v2  ;;  %v682_v8 = vld [vmem:[#allocation5 + $0x44] ss:$8 sps:$4 sm:$0xff]   ;;  %v684_v9 = vld [vmem:[#allocation5 + $0x40] ss:$8 sps:$4 sm:$0xff]   ;;  %v685_v10 = vld [vmem:[#allocation5 + $0x54] ss:$8 sps:$4 sm:$0xff]  }
  0x3b   :  { %v687_v11 = vld [vmem:[#allocation5 + $0x50] ss:$8 sps:$4 sm:$0xff]   ;;  %v688_v12 = vld [vmem:[#allocation5 + $0x64] ss:$8 sps:$4 sm:$0xff]   ;;  %v690_v15 = vld [vmem:[#allocation5 + $0x60] ss:$8 sps:$4 sm:$0xff]  }
  0x3c   :  { %v943_v13 = vld [vmem:[#allocation2 + $0x8] sm:$0xff]  ;;  %v945_v14 = vld [vmem:[#allocation2 + $0x18] sm:$0xff]  ;;  %v62_v55 = vld [vmem:[#allocation2] sm:$0xff]  ;;  %s867_s8 = smov [#allocation8]  }
  0x3d   :  { %275 = vmatpush1.bf16.msra.mxu0 %v675_v3  ;;  %v691_v16 = vld [vmem:[#allocation5 + $0x74] ss:$8 sps:$4 sm:$0xff]   ;;  %v67_v17 = vpack.c.bf16 %v945_v14, %v943_v13  ;;  %v718_v18 = vld [vmem:[#allocation7 + $0x4] ss:$8 sps:$4 sm:$0xff]   ;;  %v720_v19 = vld [vmem:[#allocation7] ss:$8 sps:$4 sm:$0xff]  }
  0x3e   :  { %276 = vmatprep.subr.bf16.mxu0 %v676_v4  ;;  %v721_v20 = vld [vmem:[#allocation7 + $0x14] ss:$8 sps:$4 sm:$0xff]   ;;  %513 = vmatprep.subr.bf16.mxu1 %v718_v18  ;;  %v723_v21 = vld [vmem:[#allocation7 + $0x10] ss:$8 sps:$4 sm:$0xff]   ;;  %v724_v23 = vld [vmem:[#allocation7 + $0x24] ss:$8 sps:$4 sm:$0xff]  }
  0x3f   :  { %304 = vmatprep.mubr.bf16.mxu0 %v67_v17  ;;  %514 = vmatpush1.bf16.msra.mxu1 %v720_v19  ;;  %v693_v22 = vld [vmem:[#allocation5 + $0x70] ss:$8 sps:$4 sm:$0xff]   ;;  %v694_v24 = vld [vmem:[#allocation5 + $0x84] ss:$8 sps:$4 sm:$0xff]   ;;  %v726_v25 = vld [vmem:[#allocation7 + $0x20] ss:$8 sps:$4 sm:$0xff]  }
  0x40   :  { %515 = vmatprep.subr.bf16.mxu1 %v721_v20  ;;  %v696_v26 = vld [vmem:[#allocation5 + $0x80] ss:$8 sps:$4 sm:$0xff]   ;;  %v727_v27 = vld [vmem:[#allocation7 + $0x34] ss:$8 sps:$4 sm:$0xff]   ;;  %v729_v29 = vld [vmem:[#allocation7 + $0x30] ss:$8 sps:$4 sm:$0xff]  }
  0x41   :  { %277 = vmatpush1.bf16.msra.mxu0 %v678_v5  ;;  %v697_v28 = vld [vmem:[#allocation5 + $0x94] ss:$8 sps:$4 sm:$0xff]   ;;  %v699_v30 = vld [vmem:[#allocation5 + $0x90] ss:$8 sps:$4 sm:$0xff]   ;;  %v730_v31 = vld [vmem:[#allocation7 + $0x44] ss:$8 sps:$4 sm:$0xff]  }
  0x42   :  { %278 = vmatprep.subr.bf16.mxu0 %v679_v6  ;;  %v700_v32 = vld [vmem:[#allocation5 + $0xa4] ss:$8 sps:$4 sm:$0xff]   ;;  %v732_v33 = vld [vmem:[#allocation7 + $0x40] ss:$8 sps:$4 sm:$0xff]   ;;  %v733_v35 = vld [vmem:[#allocation7 + $0x54] ss:$8 sps:$4 sm:$0xff]   ;;  %v102_v6 = vlaneseq }
  0x43   :  { %516 = vmatpush1.bf16.msra.mxu1 %v723_v21  ;;  %v702_v34 = vld [vmem:[#allocation5 + $0xa0] ss:$8 sps:$4 sm:$0xff]   ;;  %v703_v36 = vld [vmem:[#allocation5 + $0xb4] ss:$8 sps:$4 sm:$0xff]   ;;  %v735_v37 = vld [vmem:[#allocation7 + $0x50] ss:$8 sps:$4 sm:$0xff]  }
  0x44   :  { %517 = vmatprep.subr.bf16.mxu1 %v724_v23  ;;  %v705_v38 = vld [vmem:[#allocation5 + $0xb0] ss:$8 sps:$4 sm:$0xff]   ;;  %v736_v39 = vld [vmem:[#allocation7 + $0x64] ss:$8 sps:$4 sm:$0xff]   ;;  %v738_v41 = vld [vmem:[#allocation7 + $0x60] ss:$8 sps:$4 sm:$0xff]  }
  0x45   :  { %279 = vmatpush1.bf16.msra.mxu0 %v681_v7  ;;  %v706_v40 = vld [vmem:[#allocation5 + $0xc4] ss:$8 sps:$4 sm:$0xff]   ;;  %v708_v42 = vld [vmem:[#allocation5 + $0xc0] ss:$8 sps:$4 sm:$0xff]   ;;  %v739_v43 = vld [vmem:[#allocation7 + $0x74] ss:$8 sps:$4 sm:$0xff]  }
  0x46   :  { %280 = vmatprep.subr.bf16.mxu0 %v682_v8  ;;  %v709_v44 = vld [vmem:[#allocation5 + $0xd4] ss:$8 sps:$4 sm:$0xff]   ;;  %v741_v45 = vld [vmem:[#allocation7 + $0x70] ss:$8 sps:$4 sm:$0xff]   ;;  %v742_v47 = vld [vmem:[#allocation7 + $0x84] ss:$8 sps:$4 sm:$0xff]  }
  0x47   :  { %518 = vmatpush1.bf16.msra.mxu1 %v726_v25  ;;  %v711_v46 = vld [vmem:[#allocation5 + $0xd0] ss:$8 sps:$4 sm:$0xff]   ;;  %v712_v48 = vld [vmem:[#allocation5 + $0xe4] ss:$8 sps:$4 sm:$0xff]   ;;  %v744_v49 = vld [vmem:[#allocation7 + $0x80] ss:$8 sps:$4 sm:$0xff]  }
  0x48   :  { %519 = vmatprep.subr.bf16.mxu1 %v727_v27  ;;  %v714_v50 = vld [vmem:[#allocation5 + $0xe0] ss:$8 sps:$4 sm:$0xff]   ;;  %v745_v51 = vld [vmem:[#allocation7 + $0x94] ss:$8 sps:$4 sm:$0xff]   ;;  %v717_v53 = vld [vmem:[#allocation5 + $0xf0] ss:$8 sps:$4 sm:$0xff]  }
  0x49   :  { %281 = vmatpush1.bf16.msra.mxu0 %v684_v9  ;;  %v715_v52 = vld [vmem:[#allocation5 + $0xf4] ss:$8 sps:$4 sm:$0xff]   ;;  %v747_v54 = vld [vmem:[#allocation7 + $0x90] ss:$8 sps:$4 sm:$0xff]   ;;  %v748_v57 = vld [vmem:[#allocation7 + $0xa4] ss:$8 sps:$4 sm:$0xff]  }
  0x4a   :  { %282 = vmatprep.subr.bf16.mxu0 %v685_v10  ;;  %v949_v56 = vld [vmem:[#allocation2 + $0x10] sm:$0xff]  ;;  %v750_v59 = vld [vmem:[#allocation7 + $0xa0] ss:$8 sps:$4 sm:$0xff]   ;;  %v754_v62 = vld [vmem:[#allocation7 + $0xc4] ss:$8 sps:$4 sm:$0xff]   ;;  %v103_v7 = vshrl.u32 %v102_v6, 7 }
  0x4b   :  { %520 = vmatpush1.bf16.msra.mxu1 %v729_v29  ;;  %v66_v58 = vpack.c.bf16 %v949_v56, %v62_v55  ;;  %v751_v60 = vld [vmem:[#allocation7 + $0xb4] ss:$8 sps:$4 sm:$0xff]   ;;  %v753_v61 = vld [vmem:[#allocation7 + $0xb0] ss:$8 sps:$4 sm:$0xff]   ;;  %v756_v63 = vld [vmem:[#allocation7 + $0xc0] ss:$8 sps:$4 sm:$0xff]  }
  0x4c   :  { %521 = vmatprep.subr.bf16.mxu1 %v730_v31  ;;  %v757_v0 = vld [vmem:[#allocation7 + $0xd4] ss:$8 sps:$4 sm:$0xff]   ;;  %v759_v1 = vld [vmem:[#allocation7 + $0xd0] ss:$8 sps:$4 sm:$0xff]   ;;  %v760_v2 = vld [vmem:[#allocation7 + $0xe4] ss:$8 sps:$4 sm:$0xff]  }
  0x4d   :  { %283 = vmatpush1.bf16.msra.mxu0 %v687_v11  ;;  %v762_v3 = vld [vmem:[#allocation7 + $0xe0] ss:$8 sps:$4 sm:$0xff]   ;;  %v763_v4 = vld [vmem:[#allocation7 + $0xf4] ss:$8 sps:$4 sm:$0xff]   ;;  %v765_v5 = vld [vmem:[#allocation7 + $0xf0] ss:$8 sps:$4 sm:$0xff]  }
  0x4e   :  { %284 = vmatprep.subr.bf16.mxu0 %v688_v12  ;;  %v104_v8 = vsub.s32 0, %v103_v7  ;;  %v100_v9 = vld [vmem:[%s978_s2] sm:$0x3]  ;;  %v108_v10 = vsub.s32 1, %v103_v7  ;;  %s585_s9 = sshll.u32 %s867_s8, 4  ;;  %s586_s9 = int_to_ptr.vmem [resolvable:$true] %s585_s9 }
  0x4f   :  { %522 = vmatpush1.bf16.msra.mxu1 %v732_v33  ;;  %v560_v29 = vld [vmem:[%s980_s4] sm:$0x3]  ;;  %s832_s4 = scalar_lea.vmem %s586_s9, 512  ;;  %p837_p11 = scmp.lt.s32.totalorder %s586_s9, %s586_s9 }
  0x50   :  { %523 = vmatprep.subr.bf16.mxu1 %v733_v35  ;;  %v105_v11 = vrot.slane %v100_v9, %v104_v8  ;;  %v109_v12 = vrot.slane %v100_v9, %v108_v10  ;;  %p833_p10 = scmp.ne.s32.totalorder %s586_s9, %s832_s4  ;;  %p838_p12 = scmp.lt.s32.totalorder %s832_s4, %s832_s4 }
  0x51   :  { %285 = vmatpush1.bf16.msra.mxu0 %v690_v15 }
  0x52   :  { %286 = vmatprep.subr.bf16.mxu0 %v691_v16  ;;  %p839_p13 = por %p838_p12, %p837_p11 }
  0x53   :  { %524 = vmatpush1.bf16.msra.mxu1 %v735_v37 }
  0x54   :  { %525 = vmatprep.subr.bf16.mxu1 %v736_v39  ;;  %p840_p0 = pnand %p839_p13, %p833_p10 }
  0x55   :  { %287 = vmatpush1.bf16.msra.mxu0 %v693_v22 }
  0x56   :  { %288 = vmatprep.subr.bf16.mxu0 %v694_v24 }
  0x57   :  { %526 = vmatpush1.bf16.msra.mxu1 %v738_v41 }
  0x58   :  { %527 = vmatprep.subr.bf16.mxu1 %v739_v43 }
  0x59   :  { %289 = vmatpush1.bf16.msra.mxu0 %v696_v26 }
  0x5a   :  { %290 = vmatprep.subr.bf16.mxu0 %v697_v28 }
  0x5b   :  { %528 = vmatpush1.bf16.msra.mxu1 %v741_v45 }
  0x5c   :  { %529 = vmatprep.subr.bf16.mxu1 %v742_v47 }
  0x5d   :  { %291 = vmatpush1.bf16.msra.mxu0 %v699_v30  ;;  %v565_v30 = vrot.slane %v560_v29, %v104_v8 }
  0x5e   :  { %292 = vmatprep.subr.bf16.mxu0 %v700_v32  ;;  %v569_v32 = vrot.slane %v560_v29, %v108_v10 }
  0x5f   :  { %530 = vmatpush1.bf16.msra.mxu1 %v744_v49 }
  0x60   :  { %531 = vmatprep.subr.bf16.mxu1 %v745_v51 }
  0x61   :  { %293 = vmatpush1.bf16.msra.mxu0 %v702_v34 }
  0x62   :  { %294 = vmatprep.subr.bf16.mxu0 %v703_v36 }
  0x63   :  { %532 = vmatpush1.bf16.msra.mxu1 %v747_v54 }
  0x64   :  { %533 = vmatprep.subr.bf16.mxu1 %v748_v57 }
  0x65   :  { %295 = vmatpush1.bf16.msra.mxu0 %v705_v38 }
  0x66   :  { %296 = vmatprep.subr.bf16.mxu0 %v706_v40 }
  0x67   :  { %534 = vmatpush1.bf16.msra.mxu1 %v750_v59 }
  0x68   :  { %535 = vmatprep.subr.bf16.mxu1 %v751_v60 }
  0x69   :  { %297 = vmatpush1.bf16.msra.mxu0 %v708_v42 }
  0x6a   :  { %298 = vmatprep.subr.bf16.mxu0 %v709_v44 }
  0x6b   :  { %536 = vmatpush1.bf16.msra.mxu1 %v753_v61 }
  0x6c   :  { %537 = vmatprep.subr.bf16.mxu1 %v754_v62 }
  0x6d   :  { %299 = vmatpush1.bf16.msra.mxu0 %v711_v46 }
  0x6e   :  { %300 = vmatprep.subr.bf16.mxu0 %v712_v48 }
  0x6f   :  { %538 = vmatpush1.bf16.msra.mxu1 %v756_v63 }
  0x70   :  { %539 = vmatprep.subr.bf16.mxu1 %v757_v0 }
  0x71   :  { %301 = vmatpush1.bf16.msra.mxu0 %v714_v50 }
  0x72   :  { %302 = vmatprep.subr.bf16.mxu0 %v715_v52 }
  0x73   :  { %540 = vmatpush1.bf16.msra.mxu1 %v759_v1 }
  0x74   :  { %541 = vmatprep.subr.bf16.mxu1 %v760_v2 }
  0x75   :  { %303 = vmatpush1.bf16.msra.mxu0 %v717_v53 }
  0x77   :  { %542 = vmatpush1.bf16.msra.mxu1 %v762_v3 }
  0x78   :  { %305 = vmatmul.mubr.bf16.vlgmr.msra.gmra.mrb[0].mxu0 %v66_v58  ;;  %543 = vmatprep.subr.bf16.mxu1 %v763_v4 }
  0x7b   :  { %544 = vmatpush1.bf16.msra.mxu1 %v765_v5 }
 0x14b   :  { %v306_v15 = vpop.f32.mrb[0].mxu0 }
 0x14c   :  { %v307_v16 = vadd.f32 %v306_v15, %v105_v11  ;;  %v308_v17 = vpop.f32.mrb[1].mxu0 }
 0x14d   :  { %v309_v18 = vadd.f32 %v308_v17, %v109_v12  ;;  %v310_v19 = vpop.f32.mrb[2].mxu0 }
 0x14e   :  { %v311_v20 = vadd.f32 %v310_v19, %v105_v11  ;;  %v312_v21 = vpop.f32.mrb[3].mxu0  ;;  %v315_v23 = vmax.f32 %v307_v16, 0.0 }
 0x14f   :  { %v313_v22 = vadd.f32 %v312_v21, %v109_v12  ;;  %v316_v25 = vmax.f32 %v309_v18, 0.0 }
 0x150   :  { %v317_v24 = vmax.f32 %v311_v20, 0.0 }
 0x151   :  { %v318_v26 = vmax.f32 %v313_v22, 0.0 }
 0x152   :  { %v319_v27 = vpack.c.bf16 %v317_v24, %v315_v23 }
 0x153   :  { %v320_v28 = vpack.c.bf16 %v318_v26, %v316_v25 }
 0x155   :  { %545 = vmatprep.mubr.bf16.mxu1 %v320_v28 }
 0x156   :  { %546 = vmatmul.mubr.bf16.vlgmr.msra.gmra.mrb[0].mxu1 %v319_v27 }
 0x229   :  { %v547_v31 = vpop.f32.mrb[0].mxu1 }
 0x22a   :  { %v556_v33 = vadd.f32 %v547_v31, %v62_v55  ;;  %v549_v34 = vpop.f32.mrb[1].mxu1 }
 0x22b   :  { %v557_v35 = vadd.f32 %v549_v34, %v943_v13  ;;  %v551_v36 = vpop.f32.mrb[2].mxu1 }
 0x22c   :  { %v572_v37 = vadd.f32 %v565_v30, %v556_v33  ;;  %v558_v38 = vadd.f32 %v551_v36, %v949_v56  ;;  %v553_v39 = vpop.f32.mrb[3].mxu1 }
 0x22d   :  { %v573_v40 = vadd.f32 %v569_v32, %v557_v35  ;;  %v559_v41 = vadd.f32 %v553_v39, %v945_v14 }
 0x22e   :  { %576 = vst [vmem:[#allocation8] sm:$0xff] %v572_v37  ;;  %v574_v42 = vadd.f32 %v565_v30, %v558_v38 }
 0x22f   :  { %577 = vst [vmem:[#allocation8 + $0x8] sm:$0xff] %v573_v40  ;;  %v575_v43 = vadd.f32 %v569_v32, %v559_v41 }
 0x230   :  { %578 = vst [vmem:[#allocation8 + $0x10] sm:$0xff] %v574_v42 }
 0x231   :  { %579 = vst [vmem:[#allocation8 + $0x18] sm:$0xff] %v575_v43 }
 0x232   :  { %843 = shalt.err (!%p840_p0)
}
 0x233   :  { %s844_s12 = scalar_lea.hbm %s981_s5, 512 }
 0x234   :  { %p845_p1 = scmp.ne.s32.totalorder %s981_s5, %s844_s12  ;;  %p848_p2 = scmp.lt.u32.totalorder %s844_s12, %s981_s5 }
 0x236   :  { %p850_p3 = pnand %p848_p2, %p845_p1 }
 0x238   :  { %853 = shalt.err (!%p850_p3)
}
 0x239   :  { %591 = dma.vmem_to_hbm [thread:$0]  %s586_s9, 512, %s981_s5, [#allocation4], %s864_s1, %s864_s1, %s865_s17  }
 0x23a   :  { %858 = dma.done.wait [#allocation4], 512  }
 0x23b   :  { %859 = vsyncadd [#allocation4], 4294966784 }
 0x23c   :  { %595 = vsyncpa [#allocation3], 1 }
 0x23d   :  { %596 = vsyncpa [#allocation6], 1 }
 0x23e   :  { %597 = vsyncpa [#allocation4], 1 }

// kernel: tpu_custom_call.1
= control target key start
LH: loop header
LB: loop body
LE: loop exit
PB: predicated region body
PF: predicated region fallthrough
CT: control target
= control target key end

     0   :  { %10 = vsyncpa [#allocation3], 0  ;;  %s976_s0 = inlined_call_operand.hbm [shape: f32[16,256], index: 0, kind: input, shape index: {}]   ;;  %s977_s1 = inlined_call_operand.hbm [shape: bf16[256,256], index: 1, kind: input, shape index: {}]   ;;  %s978_s2 = inlined_call_operand.vmem [shape: f32[1,256], index: 2, kind: input, shape index: {}]   ;;  %s979_s3 = inlined_call_operand.hbm [shape: bf16[256,256], index: 3, kind: input, shape index: {}]   ;;  %s980_s4 = inlined_call_operand.vmem [shape: f32[1,256], index: 4, kind: input, shape index: {}]   ;;  %s981_s5 = inlined_call_operand.hbm [shape: f32[16,256], index: 5, kind: output, shape index: {}]  }
   0x1   :  { %11 = vsyncpa [#allocation6], 0 }
   0x2   :  { %12 = vsyncpa [#allocation4], 0  ;;  %s860_s18 = smov [#allocation5]   ;;  %s766_s22 = scalar_lea.hbm %s977_s1, 4096 }
   0x3   :  { %s30_s19 = sshll.u32 %s860_s18, 4  ;;  %p767_p0 = scmp.ne.s32.totalorder %s977_s1, %s766_s22  ;;  %s31_s19 = int_to_ptr.vmem [resolvable:$true] %s30_s19 }
   0x4   :  { %p770_p1 = scmp.lt.u32.totalorder %s766_s22, %s977_s1 }
   0x6   :  { %p772_p2 = pnand %p770_p1, %p767_p0 }
   0x8   :  { %775 = shalt.err (!%p772_p2)
}
   0x9   :  { %s776_s27 = scalar_lea.vmem %s31_s19, 4096  ;;  %p781_p4 = scmp.lt.s32.totalorder %s31_s19, %s31_s19 }
   0xa   :  { %p777_p3 = scmp.ne.s32.totalorder %s31_s19, %s776_s27  ;;  %p782_p5 = scmp.lt.s32.totalorder %s776_s27, %s776_s27 }
   0xc   :  { %p783_p6 = por %p782_p5, %p781_p4 }
   0xe   :  { %p784_p7 = pnand %p783_p6, %p777_p3 }
  0x10   :  { %787 = shalt.err (!%p784_p7)
}
  0x11   :  { %s861_s28 = smov 128   ;;  %s862_s29 = smov 8  }
  0x12   :  { %36 = dma.hbm_to_vmem [thread:$0]  %s977_s1, 4096, %s31_s19, [#allocation6], %s861_s28, %s861_s28, %s862_s29  }
  0x13   :  { %s863_s7 = smov [#allocation2]   ;;  %s788_s11 = scalar_lea.hbm %s976_s0, 512 }
  0x14   :  { %s18_s8 = sshll.u32 %s863_s7, 4  ;;  %p789_p8 = scmp.ne.s32.totalorder %s976_s0, %s788_s11  ;;  %s19_s8 = int_to_ptr.vmem [resolvable:$true] %s18_s8 }
  0x15   :  { %p792_p9 = scmp.lt.u32.totalorder %s788_s11, %s976_s0 }
  0x17   :  { %p794_p10 = pnand %p792_p9, %p789_p8 }
  0x19   :  { %797 = shalt.err (!%p794_p10)
}
  0x1a   :  { %s798_s16 = scalar_lea.vmem %s19_s8, 512  ;;  %p803_p12 = scmp.lt.s32.totalorder %s19_s8, %s19_s8 }
  0x1b   :  { %p799_p11 = scmp.ne.s32.totalorder %s19_s8, %s798_s16  ;;  %p804_p13 = scmp.lt.s32.totalorder %s798_s16, %s798_s16 }
  0x1d   :  { %p805_p0 = por %p804_p13, %p803_p12 }
  0x1f   :  { %p806_p1 = pnand %p805_p0, %p799_p11 }
  0x21   :  { %809 = shalt.err (!%p806_p1)
}
  0x22   :  { %s864_s1 = smov 256   ;;  %s865_s17 = smov 16  }
  0x23   :  { %24 = dma.hbm_to_vmem [thread:$0]  %s976_s0, 512, %s19_s8, [#allocation3], %s864_s1, %s864_s1, %s865_s17  }
  0x24   :  { %s866_s20 = smov [#allocation7]   ;;  %s810_s24 = scalar_lea.hbm %s979_s3, 4096 }
  0x25   :  { %s44_s21 = sshll.u32 %s866_s20, 4  ;;  %p811_p2 = scmp.ne.s32.totalorder %s979_s3, %s810_s24  ;;  %s45_s21 = int_to_ptr.vmem [resolvable:$true] %s44_s21 }
  0x26   :  { %p814_p3 = scmp.lt.u32.totalorder %s810_s24, %s979_s3 }
  0x28   :  { %p816_p4 = pnand %p814_p3, %p811_p2 }
  0x2a   :  { %819 = shalt.err (!%p816_p4)
}
  0x2b   :  { %s820_s6 = scalar_lea.vmem %s45_s21, 4096  ;;  %p825_p6 = scmp.lt.s32.totalorder %s45_s21, %s45_s21 }
  0x2c   :  { %p821_p5 = scmp.ne.s32.totalorder %s45_s21, %s820_s6  ;;  %p826_p7 = scmp.lt.s32.totalorder %s820_s6, %s820_s6 }
  0x2e   :  { %p827_p8 = por %p826_p7, %p825_p6 }
  0x30   :  { %p828_p9 = pnand %p827_p8, %p821_p5 }
  0x32   :  { %831 = shalt.err (!%p828_p9)
}
  0x33   :  { %50 = dma.hbm_to_vmem [thread:$0]  %s979_s3, 4096, %s45_s21, [#allocation6], %s861_s28, %s861_s28, %s862_s29  }
  0x34   :  { %854 = dma.done.wait [#allocation3], 512  }
  0x35   :  { %855 = vsyncadd [#allocation3], 4294966784 }
  0x36   :  { %856 = dma.done.wait [#allocation6], 8192  }
  0x37   :  { %857 = vsyncadd [#allocation6], 4294959104  ;;  %v670_v0 = vld [vmem:[#allocation5 + $0x4] ss:$8 sps:$4 sm:$0xff]   ;;  %v672_v1 = vld [vmem:[#allocation5] ss:$8 sps:$4 sm:$0xff]  }
  0x38   :  { %272 = vmatprep.subr.bf16.mxu0 %v670_v0  ;;  %v673_v2 = vld [vmem:[#allocation5 + $0x14] ss:$8 sps:$4 sm:$0xff]   ;;  %v675_v3 = vld [vmem:[#allocation5 + $0x10] ss:$8 sps:$4 sm:$0xff]   ;;  %v676_v4 = vld [vmem:[#allocation5 + $0x24] ss:$8 sps:$4 sm:$0xff]  }
  0x39   :  { %273 = vmatpush1.bf16.msra.mxu0 %v672_v1  ;;  %v678_v5 = vld [vmem:[#allocation5 + $0x20] ss:$8 sps:$4 sm:$0xff]   ;;  %v679_v6 = vld [vmem:[#allocation5 + $0x34] ss:$8 sps:$4 sm:$0xff]   ;;  %v681_v7 = vld [vmem:[#allocation5 + $0x30] ss:$8 sps:$4 sm:$0xff]  }
  0x3a   :  { %274 = vmatprep.subr.bf16.mxu0 %v673_v2  ;;  %v682_v8 = vld [vmem:[#allocation5 + $0x44] ss:$8 sps:$4 sm:$0xff]   ;;  %v684_v9 = vld [vmem:[#allocation5 + $0x40] ss:$8 sps:$4 sm:$0xff]   ;;  %v685_v10 = vld [vmem:[#allocation5 + $0x54] ss:$8 sps:$4 sm:$0xff]  }
  0x3b   :  { %v687_v11 = vld [vmem:[#allocation5 + $0x50] ss:$8 sps:$4 sm:$0xff]   ;;  %v688_v12 = vld [vmem:[#allocation5 + $0x64] ss:$8 sps:$4 sm:$0xff]   ;;  %v690_v15 = vld [vmem:[#allocation5 + $0x60] ss:$8 sps:$4 sm:$0xff]  }
  0x3c   :  { %v943_v13 = vld [vmem:[#allocation2 + $0x8] sm:$0xff]  ;;  %v945_v14 = vld [vmem:[#allocation2 + $0x18] sm:$0xff]  ;;  %v62_v55 = vld [vmem:[#allocation2] sm:$0xff]  ;;  %s867_s8 = smov [#allocation8]  }
  0x3d   :  { %275 = vmatpush1.bf16.msra.mxu0 %v675_v3  ;;  %v691_v16 = vld [vmem:[#allocation5 + $0x74] ss:$8 sps:$4 sm:$0xff]   ;;  %v67_v17 = vpack.c.bf16 %v945_v14, %v943_v13  ;;  %v718_v18 = vld [vmem:[#allocation7 + $0x4] ss:$8 sps:$4 sm:$0xff]   ;;  %v720_v19 = vld [vmem:[#allocation7] ss:$8 sps:$4 sm:$0xff]  }
  0x3e   :  { %276 = vmatprep.subr.bf16.mxu0 %v676_v4  ;;  %v721_v20 = vld [vmem:[#allocation7 + $0x14] ss:$8 sps:$4 sm:$0xff]   ;;  %513 = vmatprep.subr.bf16.mxu1 %v718_v18  ;;  %v723_v21 = vld [vmem:[#allocation7 + $0x10] ss:$8 sps:$4 sm:$0xff]   ;;  %v724_v23 = vld [vmem:[#allocation7 + $0x24] ss:$8 sps:$4 sm:$0xff]  }
  0x3f   :  { %304 = vmatprep.mubr.bf16.mxu0 %v67_v17  ;;  %514 = vmatpush1.bf16.msra.mxu1 %v720_v19  ;;  %v693_v22 = vld [vmem:[#allocation5 + $0x70] ss:$8 sps:$4 sm:$0xff]   ;;  %v694_v24 = vld [vmem:[#allocation5 + $0x84] ss:$8 sps:$4 sm:$0xff]   ;;  %v726_v25 = vld [vmem:[#allocation7 + $0x20] ss:$8 sps:$4 sm:$0xff]  }
  0x40   :  { %515 = vmatprep.subr.bf16.mxu1 %v721_v20  ;;  %v696_v26 = vld [vmem:[#allocation5 + $0x80] ss:$8 sps:$4 sm:$0xff]   ;;  %v727_v27 = vld [vmem:[#allocation7 + $0x34] ss:$8 sps:$4 sm:$0xff]   ;;  %v729_v29 = vld [vmem:[#allocation7 + $0x30] ss:$8 sps:$4 sm:$0xff]  }
  0x41   :  { %277 = vmatpush1.bf16.msra.mxu0 %v678_v5  ;;  %v697_v28 = vld [vmem:[#allocation5 + $0x94] ss:$8 sps:$4 sm:$0xff]   ;;  %v699_v30 = vld [vmem:[#allocation5 + $0x90] ss:$8 sps:$4 sm:$0xff]   ;;  %v730_v31 = vld [vmem:[#allocation7 + $0x44] ss:$8 sps:$4 sm:$0xff]  }
  0x42   :  { %278 = vmatprep.subr.bf16.mxu0 %v679_v6  ;;  %v700_v32 = vld [vmem:[#allocation5 + $0xa4] ss:$8 sps:$4 sm:$0xff]   ;;  %v732_v33 = vld [vmem:[#allocation7 + $0x40] ss:$8 sps:$4 sm:$0xff]   ;;  %v733_v35 = vld [vmem:[#allocation7 + $0x54] ss:$8 sps:$4 sm:$0xff]   ;;  %v102_v6 = vlaneseq }
  0x43   :  { %516 = vmatpush1.bf16.msra.mxu1 %v723_v21  ;;  %v702_v34 = vld [vmem:[#allocation5 + $0xa0] ss:$8 sps:$4 sm:$0xff]   ;;  %v703_v36 = vld [vmem:[#allocation5 + $0xb4] ss:$8 sps:$4 sm:$0xff]   ;;  %v735_v37 = vld [vmem:[#allocation7 + $0x50] ss:$8 sps:$4 sm:$0xff]  }
  0x44   :  { %517 = vmatprep.subr.bf16.mxu1 %v724_v23  ;;  %v705_v38 = vld [vmem:[#allocation5 + $0xb0] ss:$8 sps:$4 sm:$0xff]   ;;  %v736_v39 = vld [vmem:[#allocation7 + $0x64] ss:$8 sps:$4 sm:$0xff]   ;;  %v738_v41 = vld [vmem:[#allocation7 + $0x60] ss:$8 sps:$4 sm:$0xff]  }
  0x45   :  { %279 = vmatpush1.bf16.msra.mxu0 %v681_v7  ;;  %v706_v40 = vld [vmem:[#allocation5 + $0xc4] ss:$8 sps:$4 sm:$0xff]   ;;  %v708_v42 = vld [vmem:[#allocation5 + $0xc0] ss:$8 sps:$4 sm:$0xff]   ;;  %v739_v43 = vld [vmem:[#allocation7 + $0x74] ss:$8 sps:$4 sm:$0xff]  }
  0x46   :  { %280 = vmatprep.subr.bf16.mxu0 %v682_v8  ;;  %v709_v44 = vld [vmem:[#allocation5 + $0xd4] ss:$8 sps:$4 sm:$0xff]   ;;  %v741_v45 = vld [vmem:[#allocation7 + $0x70] ss:$8 sps:$4 sm:$0xff]   ;;  %v742_v47 = vld [vmem:[#allocation7 + $0x84] ss:$8 sps:$4 sm:$0xff]  }
  0x47   :  { %518 = vmatpush1.bf16.msra.mxu1 %v726_v25  ;;  %v711_v46 = vld [vmem:[#allocation5 + $0xd0] ss:$8 sps:$4 sm:$0xff]   ;;  %v712_v48 = vld [vmem:[#allocation5 + $0xe4] ss:$8 sps:$4 sm:$0xff]   ;;  %v744_v49 = vld [vmem:[#allocation7 + $0x80] ss:$8 sps:$4 sm:$0xff]  }
  0x48   :  { %519 = vmatprep.subr.bf16.mxu1 %v727_v27  ;;  %v714_v50 = vld [vmem:[#allocation5 + $0xe0] ss:$8 sps:$4 sm:$0xff]   ;;  %v745_v51 = vld [vmem:[#allocation7 + $0x94] ss:$8 sps:$4 sm:$0xff]   ;;  %v717_v53 = vld [vmem:[#allocation5 + $0xf0] ss:$8 sps:$4 sm:$0xff]  }
  0x49   :  { %281 = vmatpush1.bf16.msra.mxu0 %v684_v9  ;;  %v715_v52 = vld [vmem:[#allocation5 + $0xf4] ss:$8 sps:$4 sm:$0xff]   ;;  %v747_v54 = vld [vmem:[#allocation7 + $0x90] ss:$8 sps:$4 sm:$0xff]   ;;  %v748_v57 = vld [vmem:[#allocation7 + $0xa4] ss:$8 sps:$4 sm:$0xff]  }
  0x4a   :  { %282 = vmatprep.subr.bf16.mxu0 %v685_v10  ;;  %v949_v56 = vld [vmem:[#allocation2 + $0x10] sm:$0xff]  ;;  %v750_v59 = vld [vmem:[#allocation7 + $0xa0] ss:$8 sps:$4 sm:$0xff]   ;;  %v754_v62 = vld [vmem:[#allocation7 + $0xc4] ss:$8 sps:$4 sm:$0xff]   ;;  %v103_v7 = vshrl.u32 %v102_v6, 7 }
  0x4b   :  { %520 = vmatpush1.bf16.msra.mxu1 %v729_v29  ;;  %v66_v58 = vpack.c.bf16 %v949_v56, %v62_v55  ;;  %v751_v60 = vld [vmem:[#allocation7 + $0xb4] ss:$8 sps:$4 sm:$0xff]   ;;  %v753_v61 = vld [vmem:[#allocation7 + $0xb0] ss:$8 sps:$4 sm:$0xff]   ;;  %v756_v63 = vld [vmem:[#allocation7 + $0xc0] ss:$8 sps:$4 sm:$0xff]  }
  0x4c   :  { %521 = vmatprep.subr.bf16.mxu1 %v730_v31  ;;  %v757_v0 = vld [vmem:[#allocation7 + $0xd4] ss:$8 sps:$4 sm:$0xff]   ;;  %v759_v1 = vld [vmem:[#allocation7 + $0xd0] ss:$8 sps:$4 sm:$0xff]   ;;  %v760_v2 = vld [vmem:[#allocation7 + $0xe4] ss:$8 sps:$4 sm:$0xff]  }
  0x4d   :  { %283 = vmatpush1.bf16.msra.mxu0 %v687_v11  ;;  %v762_v3 = vld [vmem:[#allocation7 + $0xe0] ss:$8 sps:$4 sm:$0xff]   ;;  %v763_v4 = vld [vmem:[#allocation7 + $0xf4] ss:$8 sps:$4 sm:$0xff]   ;;  %v765_v5 = vld [vmem:[#allocation7 + $0xf0] ss:$8 sps:$4 sm:$0xff]  }
  0x4e   :  { %284 = vmatprep.subr.bf16.mxu0 %v688_v12  ;;  %v104_v8 = vsub.s32 0, %v103_v7  ;;  %v100_v9 = vld [vmem:[%s978_s2] sm:$0x3]  ;;  %v108_v10 = vsub.s32 1, %v103_v7  ;;  %s585_s9 = sshll.u32 %s867_s8, 4  ;;  %s586_s9 = int_to_ptr.vmem [resolvable:$true] %s585_s9 }
  0x4f   :  { %522 = vmatpush1.bf16.msra.mxu1 %v732_v33  ;;  %v560_v29 = vld [vmem:[%s980_s4] sm:$0x3]  ;;  %s832_s4 = scalar_lea.vmem %s586_s9, 512  ;;  %p837_p11 = scmp.lt.s32.totalorder %s586_s9, %s586_s9 }
  0x50   :  { %523 = vmatprep.subr.bf16.mxu1 %v733_v35  ;;  %v105_v11 = vrot.slane %v100_v9, %v104_v8  ;;  %v109_v12 = vrot.slane %v100_v9, %v108_v10  ;;  %p833_p10 = scmp.ne.s32.totalorder %s586_s9, %s832_s4  ;;  %p838_p12 = scmp.lt.s32.totalorder %s832_s4, %s832_s4 }
  0x51   :  { %285 = vmatpush1.bf16.msra.mxu0 %v690_v15 }
  0x52   :  { %286 = vmatprep.subr.bf16.mxu0 %v691_v16  ;;  %p839_p13 = por %p838_p12, %p837_p11 }
  0x53   :  { %524 = vmatpush1.bf16.msra.mxu1 %v735_v37 }
  0x54   :  { %525 = vmatprep.subr.bf16.mxu1 %v736_v39  ;;  %p840_p0 = pnand %p839_p13, %p833_p10 }
  0x55   :  { %287 = vmatpush1.bf16.msra.mxu0 %v693_v22 }
  0x56   :  { %288 = vmatprep.subr.bf16.mxu0 %v694_v24 }
  0x57   :  { %526 = vmatpush1.bf16.msra.mxu1 %v738_v41 }
  0x58   :  { %527 = vmatprep.subr.bf16.mxu1 %v739_v43 }
  0x59   :  { %289 = vmatpush1.bf16.msra.mxu0 %v696_v26 }
  0x5a   :  { %290 = vmatprep.subr.bf16.mxu0 %v697_v28 }
  0x5b   :  { %528 = vmatpush1.bf16.msra.mxu1 %v741_v45 }
  0x5c   :  { %529 = vmatprep.subr.bf16.mxu1 %v742_v47 }
  0x5d   :  { %291 = vmatpush1.bf16.msra.mxu0 %v699_v30  ;;  %v565_v30 = vrot.slane %v560_v29, %v104_v8 }
  0x5e   :  { %292 = vmatprep.subr.bf16.mxu0 %v700_v32  ;;  %v569_v32 = vrot.slane %v560_v29, %v108_v10 }
  0x5f   :  { %530 = vmatpush1.bf16.msra.mxu1 %v744_v49 }
  0x60   :  { %531 = vmatprep.subr.bf16.mxu1 %v745_v51 }
  0x61   :  { %293 = vmatpush1.bf16.msra.mxu0 %v702_v34 }
  0x62   :  { %294 = vmatprep.subr.bf16.mxu0 %v703_v36 }
  0x63   :  { %532 = vmatpush1.bf16.msra.mxu1 %v747_v54 }
  0x64   :  { %533 = vmatprep.subr.bf16.mxu1 %v748_v57 }
  0x65   :  { %295 = vmatpush1.bf16.msra.mxu0 %v705_v38 }
  0x66   :  { %296 = vmatprep.subr.bf16.mxu0 %v706_v40 }
  0x67   :  { %534 = vmatpush1.bf16.msra.mxu1 %v750_v59 }
  0x68   :  { %535 = vmatprep.subr.bf16.mxu1 %v751_v60 }
  0x69   :  { %297 = vmatpush1.bf16.msra.mxu0 %v708_v42 }
  0x6a   :  { %298 = vmatprep.subr.bf16.mxu0 %v709_v44 }
  0x6b   :  { %536 = vmatpush1.bf16.msra.mxu1 %v753_v61 }
  0x6c   :  { %537 = vmatprep.subr.bf16.mxu1 %v754_v62 }
  0x6d   :  { %299 = vmatpush1.bf16.msra.mxu0 %v711_v46 }
  0x6e   :  { %300 = vmatprep.subr.bf16.mxu0 %v712_v48 }
  0x6f   :  { %538 = vmatpush1.bf16.msra.mxu1 %v756_v63 }
  0x70   :  { %539 = vmatprep.subr.bf16.mxu1 %v757_v0 }
  0x71   :  { %301 = vmatpush1.bf16.msra.mxu0 %v714_v50 }
  0x72   :  { %302 = vmatprep.subr.bf16.mxu0 %v715_v52 }
  0x73   :  { %540 = vmatpush1.bf16.msra.mxu1 %v759_v1 }
  0x74   :  { %541 = vmatprep.subr.bf16.mxu1 %v760_v2 }
  0x75   :  { %303 = vmatpush1.bf16.msra.mxu0 %v717_v53 }
  0x77   :  { %542 = vmatpush1.bf16.msra.mxu1 %v762_v3 }
  0x78   :  { %305 = vmatmul.mubr.bf16.vlgmr.msra.gmra.mrb[0].mxu0 %v66_v58  ;;  %543 = vmatprep.subr.bf16.mxu1 %v763_v4 }
  0x7b   :  { %544 = vmatpush1.bf16.msra.mxu1 %v765_v5 }
 0x14b   :  { %v306_v15 = vpop.f32.mrb[0].mxu0 }
 0x14c   :  { %v307_v16 = vadd.f32 %v306_v15, %v105_v11  ;;  %v308_v17 = vpop.f32.mrb[1].mxu0 }
 0x14d   :  { %v309_v18 = vadd.f32 %v308_v17, %v109_v12  ;;  %v310_v19 = vpop.f32.mrb[2].mxu0 }
 0x14e   :  { %v311_v20 = vadd.f32 %v310_v19, %v105_v11  ;;  %v312_v21 = vpop.f32.mrb[3].mxu0  ;;  %v315_v23 = vmax.f32 %v307_v16, 0.0 }
 0x14f   :  { %v313_v22 = vadd.f32 %v312_v21, %v109_v12  ;;  %v316_v25 = vmax.f32 %v309_v18, 0.0 }
 0x150   :  { %v317_v24 = vmax.f32 %v311_v20, 0.0 }
 0x151   :  { %v318_v26 = vmax.f32 %v313_v22, 0.0 }
 0x152   :  { %v319_v27 = vpack.c.bf16 %v317_v24, %v315_v23 }
 0x153   :  { %v320_v28 = vpack.c.bf16 %v318_v26, %v316_v25 }
 0x155   :  { %545 = vmatprep.mubr.bf16.mxu1 %v320_v28 }
 0x156   :  { %546 = vmatmul.mubr.bf16.vlgmr.msra.gmra.mrb[0].mxu1 %v319_v27 }
 0x229   :  { %v547_v31 = vpop.f32.mrb[0].mxu1 }
 0x22a   :  { %v556_v33 = vadd.f32 %v547_v31, %v62_v55  ;;  %v549_v34 = vpop.f32.mrb[1].mxu1 }
 0x22b   :  { %v557_v35 = vadd.f32 %v549_v34, %v943_v13  ;;  %v551_v36 = vpop.f32.mrb[2].mxu1 }
 0x22c   :  { %v572_v37 = vadd.f32 %v565_v30, %v556_v33  ;;  %v558_v38 = vadd.f32 %v551_v36, %v949_v56  ;;  %v553_v39 = vpop.f32.mrb[3].mxu1 }
 0x22d   :  { %v573_v40 = vadd.f32 %v569_v32, %v557_v35  ;;  %v559_v41 = vadd.f32 %v553_v39, %v945_v14 }
 0x22e   :  { %576 = vst [vmem:[#allocation8] sm:$0xff] %v572_v37  ;;  %v574_v42 = vadd.f32 %v565_v30, %v558_v38 }
 0x22f   :  { %577 = vst [vmem:[#allocation8 + $0x8] sm:$0xff] %v573_v40  ;;  %v575_v43 = vadd.f32 %v569_v32, %v559_v41 }
 0x230   :  { %578 = vst [vmem:[#allocation8 + $0x10] sm:$0xff] %v574_v42 }
 0x231   :  { %579 = vst [vmem:[#allocation8 + $0x18] sm:$0xff] %v575_v43 }
 0x232   :  { %843 = shalt.err (!%p840_p0)
}
 0x233   :  { %s844_s12 = scalar_lea.hbm %s981_s5, 512 }
 0x234   :  { %p845_p1 = scmp.ne.s32.totalorder %s981_s5, %s844_s12  ;;  %p848_p2 = scmp.lt.u32.totalorder %s844_s12, %s981_s5 }
 0x236   :  { %p850_p3 = pnand %p848_p2, %p845_p1 }
 0x238   :  { %853 = shalt.err (!%p850_p3)
}
 0x239   :  { %591 = dma.vmem_to_hbm [thread:$0]  %s586_s9, 512, %s981_s5, [#allocation4], %s864_s1, %s864_s1, %s865_s17  }
 0x23a   :  { %858 = dma.done.wait [#allocation4], 512  }
 0x23b   :  { %859 = vsyncadd [#allocation4], 4294966784 }
 0x23c   :  { %595 = vsyncpa [#allocation3], 1 }
 0x23d   :  { %596 = vsyncpa [#allocation6], 1 }
 0x23e   :  { %597 = vsyncpa [#allocation4], 1 }

</bundles_post_ra>
